<compile_context>
chip_gen: v5e
topology: v5e:2x2
jax: 0.10.0
libtpu: 0.0.40
codegen_flags: <defaults>
</compile_context>

<pallas_src>
import math

import jax
import jax.numpy as jnp
from jax.experimental import pallas as pl
from jax.experimental.pallas import tpu as pltpu


def _sage_kernel_resident(adj_ref, xwn_ref, xs_ref, out_ref, acc_ref):
    """Grid = (node tiles i, neighbor/K tiles k); xWn is fully VMEM-resident.

    adj_ref : (tn, tk)   adjacency tile (rows = node tile, cols = K tile)
    xwn_ref : (Np, Fo)   x @ W_nbr, whole padded array, resident in VMEM
    xs_ref  : (tn, Fo)   x @ W_self (+ bias) tile for this node tile
    out_ref : (tn, Fo)
    acc_ref : (tn, Fo)   f32 VMEM scratch accumulator
    """
    k = pl.program_id(1)

    @pl.when(k == 0)
    def _():
        acc_ref[...] = jnp.zeros_like(acc_ref)

    tk = adj_ref.shape[1]
    start = pl.multiple_of(k * tk, tk)
    acc_ref[...] += jnp.dot(adj_ref[...], xwn_ref[pl.ds(start, tk), :],
                            preferred_element_type=jnp.float32)

    @pl.when(k == pl.num_programs(1) - 1)
    def _():
        out_ref[...] = (acc_ref[...]
                        + xs_ref[...].astype(jnp.float32)).astype(out_ref.dtype)


def _sage_kernel_streamed(adj_ref, xwn_ref, xs_ref, out_ref, acc_ref):
    """Same as above, but xWn arrives as a (tk, Fo) K-tile (large-graph path)."""
    k = pl.program_id(1)

    @pl.when(k == 0)
    def _():
        acc_ref[...] = jnp.zeros_like(acc_ref)

    acc_ref[...] += jnp.dot(adj_ref[...], xwn_ref[...],
                            preferred_element_type=jnp.float32)

    @pl.when(k == pl.num_programs(1) - 1)
    def _():
        out_ref[...] = (acc_ref[...]
                        + xs_ref[...].astype(jnp.float32)).astype(out_ref.dtype)


def _round_up(v, m):
    return (v + m - 1) // m * m


def _lcm(a, b):
    return a * b // math.gcd(a, b)


def _pick_tile(n, requested):
    """Largest lane-aligned tile <= requested; prefer exact divisors of n so the
    adjacency never needs an N^2 pad copy."""
    req = max(128, (min(requested, _round_up(n, 128)) // 128) * 128)
    if n % 128 == 0:
        for t in range(req, 127, -128):
            if n % t == 0:
                return t
    return req


def sage_layer(x, adj, weight, bias=None, *, tn=512, tk=512, out_dtype=None,
               resident_bytes_cap=12 * 1024 * 1024):
    """x: [N, F_in], adj: [N, N], weight: [2*F_in, F_out] -> [N, F_out]."""
    N, F_in = x.shape
    F_out = weight.shape[1]
    assert weight.shape[0] == 2 * F_in
    assert adj.shape == (N, N)
    out_dtype = out_dtype or x.dtype

    # Split the weight; project features OUTSIDE the kernel (tiny matmuls):
    #   out = x @ W_self (+ bias)  +  adj @ (x @ W_nbr)
    w_self = weight[:F_in, :]
    w_nbr = weight[F_in:, :]
    xwn = jnp.dot(x, w_nbr)
    xself = jnp.dot(x, w_self)
    if bias is not None:
        xself = xself + bias
    # TODO(synk): BatchNorm1d path (batch_norm=True) not implemented in-kernel;
    # module default is batch_norm=False.

    # Tile selection: lane-aligned, divisor-preferring, lcm-consistent padding.
    tn = _pick_tile(N, tn)
    tk = _pick_tile(N, tk)
    Np = _round_up(N, _lcm(tn, tk))
    assert Np % tn == 0 and Np % tk == 0
    Fo = _round_up(F_out, 128)          # lane-dense output stores

    # Pad only what is needed.  adj pad only happens when N is not tile-aligned.
    if Np > N:
        adj_p = jnp.pad(adj, ((0, Np - N), (0, Np - N)))
    else:
        adj_p = adj
    if Np > N or Fo > F_out:
        xwn_p = jnp.pad(xwn, ((0, Np - N), (0, Fo - F_out)))
        xself_p = jnp.pad(xself, ((0, Np - N), (0, Fo - F_out)))
    else:
        xwn_p = xwn
        xself_p = xself

    grid = (Np // tn, Np // tk)

    # Keep the projected neighbor operand fully VMEM-resident when small enough
    # (budget chosen so it is safe even on v7x's 64 MiB VMEM with headroom).
    resident = (Np * Fo * xwn_p.dtype.itemsize) <= resident_bytes_cap

    if resident:
        kernel = _sage_kernel_resident
        xwn_spec = pl.BlockSpec((Np, Fo), lambda i, k: (0, 0))
    else:
        kernel = _sage_kernel_streamed
        xwn_spec = pl.BlockSpec((tk, Fo), lambda i, k: (k, 0))

    out_p = pl.pallas_call(
        kernel,
        out_shape=jax.ShapeDtypeStruct((Np, Fo), out_dtype),
        grid_spec=pltpu.PrefetchScalarGridSpec(
            num_scalar_prefetch=0,
            grid=grid,
            in_specs=[
                pl.BlockSpec((tn, tk), lambda i, k: (i, k)),   # adj tile
                xwn_spec,                                      # x @ W_nbr
                pl.BlockSpec((tn, Fo), lambda i, k: (i, 0)),   # x @ W_self
            ],
            out_specs=pl.BlockSpec((tn, Fo), lambda i, k: (i, 0)),
            scratch_shapes=[pltpu.VMEM((tn, Fo), jnp.float32)],
        ),
        compiler_params=pltpu.CompilerParams(
            dimension_semantics=("parallel", "arbitrary"),
            vmem_limit_bytes=48 * 1024 * 1024,
        ),
    )(adj_p, xwn_p, xself_p)

    return out_p[:N, :F_out]


def xavier_uniform(key, shape, dtype=jnp.float32):
    fan_in, fan_out = shape[0], shape[1]
    bound = (6.0 / (fan_in + fan_out)) ** 0.5
    return jax.random.uniform(key, shape, dtype, minval=-bound, maxval=bound)


if __name__ == "__main__":
    # Small shapes consistent with the module's forward: N nodes, F_in features.
    N, F_in, F_out = 256, 32, 32

    key = jax.random.PRNGKey(0)
    kx, ka, kw = jax.random.split(key, 3)

    x = jax.random.normal(kx, (N, F_in), dtype=jnp.float32)
    # Dense row-normalized adjacency (mean aggregation).
    adj_raw = (jax.random.uniform(ka, (N, N)) > 0.5).astype(jnp.float32)
    adj = adj_raw / jnp.maximum(adj_raw.sum(axis=-1, keepdims=True), 1.0)

    # xavier_uniform weight [2*F_in, F_out]; bias=False, batch_norm=False
    # (module defaults), so no bias/BN path is exercised.
    weight = xavier_uniform(kw, (2 * F_in, F_out))

    # Pure-JAX reference of the PyTorch forward semantics.
    mes_ref = adj @ x
    ref = jnp.concatenate([x, mes_ref], axis=-1) @ weight

    # --- f32, small tiles: exercises multi-step K accumulation + resident slab ---
    out = jax.block_until_ready(sage_layer(x, adj, weight, tn=128, tk=128))
    assert out.shape == (N, F_out)
    assert jnp.allclose(out, ref, atol=2e-3, rtol=2e-3), "f32 resident mismatch"

    # --- f32, streamed (non-resident) xWn path ---
    out_s = jax.block_until_ready(
        sage_layer(x, adj, weight, tn=128, tk=128, resident_bytes_cap=0))
    assert jnp.allclose(out_s, ref, atol=2e-3, rtol=2e-3), "f32 streamed mismatch"

    # --- bf16 streaming dtypes (f32 accumulation in-kernel), default tiles ---
    out_bf16 = jax.block_until_ready(
        sage_layer(x.astype(jnp.bfloat16),
                   adj.astype(jnp.bfloat16),
                   weight.astype(jnp.bfloat16),
                   out_dtype=jnp.float32))
    assert out_bf16.shape == (N, F_out)
    assert jnp.max(jnp.abs(out_bf16 - ref)) < 0.25, "bf16 drift too large"

    # --- ragged shapes (padding path): N, F_in, F_out not tile/lane aligned ---
    N2, Fi2, Fo2 = 200, 24, 40
    k2x, k2a, k2w = jax.random.split(jax.random.PRNGKey(1), 3)
    x2 = jax.random.normal(k2x, (N2, Fi2), dtype=jnp.float32)
    a2 = (jax.random.uniform(k2a, (N2, N2)) > 0.5).astype(jnp.float32)
    a2 = a2 / jnp.maximum(a2.sum(axis=-1, keepdims=True), 1.0)
    w2 = xavier_uniform(k2w, (2 * Fi2, Fo2))
    ref2 = jnp.concatenate([x2, a2 @ x2], axis=-1) @ w2
    out2 = jax.block_until_ready(sage_layer(x2, a2, w2))
    assert out2.shape == (N2, Fo2)
    assert jnp.allclose(out2, ref2, atol=2e-3, rtol=2e-3), "ragged-shape mismatch"

    print("KERNEL_OK")
</pallas_src>

<mosaic_0001>
module attributes {stable_mosaic.version = 11 : i64} {
  func.func @_sage_kernel_resident(%arg0: i32, %arg1: i32, %arg2: memref<128x128xf32, #tpu.memory_space<vmem>>, %arg3: memref<256x128xf32, #tpu.memory_space<vmem>>, %arg4: memref<128x128xf32, #tpu.memory_space<vmem>>, %arg5: memref<128x128xf32, #tpu.memory_space<vmem>>, %arg6: memref<128x128xf32, #tpu.memory_space<vmem>>) attributes {dimension_semantics = [#tpu.dimension_semantics<parallel>, #tpu.dimension_semantics<arbitrary>], iteration_bounds = array<i64: 2, 2>, scalar_prefetch = 0 : i64, scratch_operands = 1 : i64, tpu.core_type = #tpu.core_type<tc>, window_params = [{transform_indices = @transform_0, window_bounds = array<i64: 128, 128>}, {pipeline_mode = #tpu.pipeline_mode<synchronous>, transform_indices = @transform_1, window_bounds = array<i64: 256, 128>}, {transform_indices = @transform_2, window_bounds = array<i64: 128, 128>}, {transform_indices = @transform_3, window_bounds = array<i64: 128, 128>}]} {
    %c0_i32 = arith.constant 0 : i32
    %0 = arith.cmpi eq, %arg1, %c0_i32 : i32
    %1 = arith.extui %0 : i1 to i32
    %c0_i32_0 = arith.constant 0 : i32
    %2 = arith.cmpi ne, %1, %c0_i32_0 : i32
    scf.if %2 {
      %cst_8 = arith.constant 0.000000e+00 : f32
      %15 = vector.broadcast %cst_8 : f32 to vector<128x128xf32>
      %c0_9 = arith.constant 0 : index
      %c0_10 = arith.constant 0 : index
      %16 = vector.load %arg6[%c0_9, %c0_10] : memref<128x128xf32, #tpu.memory_space<vmem>>, vector<128x128xf32>
      tpu.vector_store %arg6[%c0_9, %c0_10], %15 {strides = array<i32>} : memref<128x128xf32, #tpu.memory_space<vmem>>, vector<128x128xf32>,
    } else {
    }
    %c128_i32 = arith.constant 128 : i32
    %3 = arith.muli %arg1, %c128_i32 : i32
    %4 = tpu.assume_multiple %3, 128 : i32
    %c0 = arith.constant 0 : index
    %c0_1 = arith.constant 0 : index
    %5 = vector.load %arg6[%c0, %c0_1] : memref<128x128xf32, #tpu.memory_space<vmem>>, vector<128x128xf32>
    %c0_2 = arith.constant 0 : index
    %c0_3 = arith.constant 0 : index
    %6 = vector.load %arg2[%c0_2, %c0_3] : memref<128x128xf32, #tpu.memory_space<vmem>>, vector<128x128xf32>
    %7 = arith.index_cast %4 : i32 to index
    %c0_4 = arith.constant 0 : index
    %8 = vector.load %arg3[%7, %c0_4] : memref<256x128xf32, #tpu.memory_space<vmem>>, vector<128x128xf32>
    %cst = arith.constant dense<0.000000e+00> : vector<128x128xf32>
    %9 = tpu.matmul %6, %8, %cst {dimension_numbers = #tpu.dot_dimension_numbers<[1], [0], [0], [1], [0, 0, 1, 1], [], []>} : vector<128x128xf32>, vector<128x128xf32>, vector<128x128xf32> -> vector<128x128xf32>
    %10 = arith.addf %5, %9 : vector<128x128xf32>
    %c0_5 = arith.constant 0 : index
    %c0_6 = arith.constant 0 : index
    %11 = vector.load %arg6[%c0_5, %c0_6] : memref<128x128xf32, #tpu.memory_space<vmem>>, vector<128x128xf32>
    tpu.vector_store %arg6[%c0_5, %c0_6], %10 {strides = array<i32>} : memref<128x128xf32, #tpu.memory_space<vmem>>, vector<128x128xf32>,
    %c1_i32 = arith.constant 1 : i32
    %12 = arith.cmpi eq, %arg1, %c1_i32 : i32
    %13 = arith.extui %12 : i1 to i32
    %c0_i32_7 = arith.constant 0 : i32
    %14 = arith.cmpi ne, %13, %c0_i32_7 : i32
    scf.if %14 {
      %c0_8 = arith.constant 0 : index
      %c0_9 = arith.constant 0 : index
      %15 = vector.load %arg6[%c0_8, %c0_9] : memref<128x128xf32, #tpu.memory_space<vmem>>, vector<128x128xf32>
      %c0_10 = arith.constant 0 : index
      %c0_11 = arith.constant 0 : index
      %16 = vector.load %arg4[%c0_10, %c0_11] : memref<128x128xf32, #tpu.memory_space<vmem>>, vector<128x128xf32>
      %17 = arith.addf %15, %16 : vector<128x128xf32>
      %c0_12 = arith.constant 0 : index
      %c0_13 = arith.constant 0 : index
      %18 = vector.load %arg5[%c0_12, %c0_13] : memref<128x128xf32, #tpu.memory_space<vmem>>, vector<128x128xf32>
      tpu.vector_store %arg5[%c0_12, %c0_13], %17 {strides = array<i32>} : memref<128x128xf32, #tpu.memory_space<vmem>>, vector<128x128xf32>,
    } else {
    }
    return
  }
  func.func @transform_0(%arg0: i32, %arg1: i32) -> (i32, i32) {
    %c0_i32 = arith.constant 0 : i32
    return %arg0, %arg1 : i32, i32
  }
  func.func @transform_1(%arg0: i32, %arg1: i32) -> (i32, i32) {
    %c0_i32 = arith.constant 0 : i32
    %c0_i32_0 = arith.constant 0 : i32
    %c0_i32_1 = arith.constant 0 : i32
    return %c0_i32, %c0_i32_0 : i32, i32
  }
  func.func @transform_2(%arg0: i32, %arg1: i32) -> (i32, i32) {
    %c0_i32 = arith.constant 0 : i32
    %c0_i32_0 = arith.constant 0 : i32
    return %arg0, %c0_i32 : i32, i32
  }
  func.func @transform_3(%arg0: i32, %arg1: i32) -> (i32, i32) {
    %c0_i32 = arith.constant 0 : i32
    %c0_i32_0 = arith.constant 0 : i32
    return %arg0, %c0_i32 : i32, i32
  }
}

</mosaic_0001>

<bundles_post_ra>
// kernel: tpu_custom_call.1
= control target key start
LH: loop header
LB: loop body
LE: loop exit
PB: predicated region body
PF: predicated region fallthrough
CT: control target
= control target key end

     0   :  { %s1404_s0 = inlined_call_operand.hbm [shape: f32[256,256], index: 0, kind: input, shape index: {}]   ;;  %s1405_s1 = inlined_call_operand.hbm [shape: f32[256,128], index: 1, kind: input, shape index: {}]   ;;  %s1406_s2 = inlined_call_operand.hbm [shape: f32[256,128], index: 2, kind: input, shape index: {}]   ;;  %s1407_s3 = inlined_call_operand.hbm [shape: f32[256,128], index: 3, kind: output, shape index: {}]  }
   0x1   :  { %1413 = sst [smem:[#allocation18_spill]] %s1404_s0 }
   0x2   :  { %1414 = sst [smem:[#allocation19_spill]] %s1405_s1 }
   0x3   :  { %1415 = sst [smem:[#allocation20_spill]] %s1407_s3 }
   0x4   :  { %8 = vsyncpa [#allocation4], 0 }
   0x5   :  { %10 = vsyncpa [#allocation4 + $0x1], 0 }
   0x6   :  { %11 = vsyncpa [#allocation7], 0 }
   0x7   :  { %12 = vsyncpa [#allocation5], 0 }
   0x8   :  { %14 = vsyncpa [#allocation5 + $0x1], 0  ;;  %s1084_s12 = smov 0   ;;  %s1086_s13 = smov 0  }
   0x9   :  { %s1088_s14 = smov 0   ;;  %s1090_s15 = smov 0  }
   0xa   :  { %s1092_s16 = smov 0   ;;  %s1094_s17 = smov 0  }
   0xb   :  { %s1096_s18 = smov 0   ;;  %s1098_s19 = smov 0  }
   0xc   :  { %s1100_s20 = smov 0   ;;  %s1102_s21 = smov 0  }
   0xd   :  { %s1104_s22 = smov 0  }
   0xe LB: > { %1416 = sst [smem:[#allocation14_spill]] %s1047_s20  ;;  %s29_s23 = sadd.s32 1, %s1047_s20  ;;  %s1055_s22 = sphi %s1104_s22, %s20_s22   ;;  %s1051_s21 = sphi %s1102_s21, %s1432_s21   ;;  %s1047_s20 = sphi %s1100_s20, %s1431_s20   ;;  %s1043_s19 = sphi %s1098_s19, %s1430_s19   ;;  %s1039_s18 = sphi %s1096_s18, %s1429_s18   ;;  %s1035_s17 = sphi %s1094_s17, %s1438_s17   ;;  %s1031_s16 = sphi %s1092_s16, %s1437_s16   ;;  %s1027_s15 = sphi %s1090_s15, %s1436_s15   ;;  %s1023_s14 = sphi %s1088_s14, %s1435_s14   ;;  %s1019_s13 = sphi %s1086_s13, %s1434_s13   ;;  %s1015_s12 = sphi %s1084_s12, %s1433_s12  }
   0xf   : > { %1417 = sst [smem:[#allocation15_spill]] %s1051_s21  ;;  %s32_s24 = sadd.s32 1, %s1051_s21 }
  0x10   : > { %p30_p0 = scmp.ge.s32.totalorder %s29_s23, 2  ;;  %s41_s25 = sadd.s32 1, %s1035_s17 }
  0x11   : > { %p48_p1 = scmp.ne.s32.totalorder %s1035_s17, %s1031_s16  ;;  %p49_p2 = scmp.eq.s32.totalorder %s1055_s22, 0 }
  0x12   : > { %s1440_s23 = smov (%p30_p0, %s29_s23), 0  ;;  %s1442_s24 = smov (!%p30_p0, %s32_s24), %s1051_s21 }
  0x13   : > { %1418 = sst [smem:[#allocation16_spill]] %s1440_s23  ;;  %s37_s26 = ssub.s32 %s1047_s20, %s1440_s23 }
  0x14   : > { %p1152_p3 = por %p49_p2, %p48_p1  ;;  %p34_p4 = scmp.ge.s32.totalorder %s1442_s24, 2 }
  0x15   : > { %p54_p5 = scmp.ne.s32.totalorder %s1031_s16, %s1027_s15  ;;  %p737_p6 = scmp.lt.s32.totalorder %s1055_s22, 4 }
  0x16   : > { %s1444_s24 = smov (%p34_p4, %s1442_s24), 0  ;;  %s165_s29 = sand.u32 1, %s1055_s22  }
  0x17   : > { %1420 = sst [smem:[#allocation17_spill]] %s1444_s24  ;;  %s1163_s28 = ssub.s32 %s1051_s21, %s1444_s24 }
  0x18   : > { %s38_s30 = sor.u32 %s37_s26, %s1163_s28  ;;  %p86_p7 = scmp.eq.s32.totalorder %s1163_s28, 0 }
  0x19   : > { %p39_p8 = scmp.eq.s32.totalorder %s38_s30, 0  ;;  %s167_s4 = sand.u32 1, %s1035_s17  }
  0x1a   : > { %s660_s5 = sshll.u32 %s1051_s21, 5  ;;  %s640_s7 = sshll.u32 %s167_s4, 7 }
  0x1b   : > { %s1171_s6 = scalar_select %p39_p8, %s1035_s17, %s41_s25  }
  0x1c   : > { %s174_s8 = sadd.s32 %s1047_s20, %s660_s5  ;;  %s1421_s0 = sld [smem:[#allocation18_spill]] }
  0x1d   : > { %s643_s9 = sshll.u32 %s174_s8, 3  ;;  %s169_s23 = scalar_lea.vmem [#allocation3], %s640_s7 }
  0x1e   : > { %s179_s3 = sshll.u32 %s169_s23, 4  ;;  %p726_p9 = pnand %p737_p6, %p1152_p3  ;;  %s180_s3 = int_to_ptr.vmem [resolvable:$true] %s179_s3 }
  0x1f   : > { %s1181_s25 = scalar_lea.sflag [#allocation4], %s165_s29  ;;  %s1057_s30 = smov 256  }
  0x20   : > { %s1058_s4 = smov 128   ;;  %s1059_s5 = smov 8  }
  0x21   : > { %s1187_s23 = sadd.s32 4294967295, %s1055_s22   ;;  %p101_p11 = scmp.ne.s32.totalorder %s1019_s13, %s1015_s12 }
  0x22   : > { %s176_s24 = scalar_lea.hbm %s1421_s0, %s643_s9  ;;  %p55_p10 = scmp.eq.s32.totalorder %s1187_s23, 0 }
  0x23   : > { %s177_s26 = sshll.u32 %s176_s24, 4  ;;  %s636_s24 = sadd.s32 4294967294, %s1055_s22   ;;  %s178_s26 = int_to_ptr.hbm [resolvable:$true] %s177_s26 }
  0x24   : > { %728 = dma.hbm_to_vmem [thread:$0]  (!%p726_p9), %s178_s26, 2048, %s180_s3, %s1181_s25, %s1057_s30, %s1058_s4, %s1059_s5  }
  0x25   : > { %p125_p12 = scmp.eq.s32.totalorder %s1187_s23, 3  ;;  %p131_p13 = scmp.eq.s32.totalorder %s636_s24, 3 }
  0x26   : > { %p1199_p0 = por %p55_p10, %p54_p5  ;;  %p1205_p1 = por %p101_p11, %p55_p10 }
  0x27   : > { %p1209_p3 = por %p131_p13, %p101_p11  ;;  %p637_p4 = scmp.ge.s32.totalorder %s1055_s22, 1 }
  0x28   : > { %p138_p8 = scmp.lt.s32.totalorder %s1055_s22, 5  ;;  %s1425_s1 = sld [smem:[#allocation19_spill]] }
  0x29   : > { %s1060_s10 = smov [#allocation6]   ;;  %s661_s26 = sshll.u32 %s1051_s21, 7 }
  0x2a   : > { %p1218_p5 = pnand %p637_p4, %p138_p8  ;;  %s151_s11 = sshll.u32 %s1060_s10, 4  ;;  %s152_s11 = int_to_ptr.vmem [resolvable:$true] %s151_s11 }
  0x2b   : > { %s88_s30 = sadd.s32 1, %s1023_s14  ;;  %p95_p13 = scmp.ne.s32.totalorder %s1023_s14, %s1019_s13 }
  0x2c   : > { %p721_p9 = pneg %p1218_p5  ;;  %s191_s7 = sand.u32 1, %s1023_s14  }
  0x2d   : > { %s1231_s24 = scalar_select %p86_p7, %s1023_s14, %s88_s30  }
  0x2e   : > { %s149_s8 = sshll.u32 %s1425_s1, 4  ;;  %p722_p11 = pnand %p721_p9, %p55_p10  ;;  %s150_s8 = int_to_ptr.hbm [resolvable:$true] %s149_s8 }
  0x2f   : > { %p97_p4 = por %p95_p13, %p49_p2  ;;  %p1242_p8 = por %p125_p12, %p95_p13 }
  0x30   : > { %724 = dma.hbm_to_vmem [thread:$0]  (!%p722_p11), %s150_s8, 4096, %s152_s11, [#allocation7], %s1058_s4, %s1058_s4, %s1059_s5  }
  0x31   : > { %s198_s1 = scalar_lea.hbm %s1406_s2, %s661_s26  ;;  %s644_s28 = sshll.u32 %s191_s7, 7 }
  0x32   : > { %s199_s30 = sshll.u32 %s198_s1, 4  ;;  %s193_s21 = scalar_lea.vmem [#allocation8], %s644_s28  ;;  %s200_s30 = int_to_ptr.hbm [resolvable:$true] %s199_s30 }
  0x33   : > { %s201_s20 = sshll.u32 %s193_s21, 4  ;;  %p729_p7 = pnand %p737_p6, %p97_p4  ;;  %s202_s20 = int_to_ptr.vmem [resolvable:$true] %s201_s20 }
  0x34   : > { %213 = sbr.rel (%p1218_p5) target bundleno = 322 (0x142), region = 32  ;;  %s215_s0 = sand.u32 (!%p1218_p5), 1, %s1187_s23  }
  0x35   : > { %731 = dma.hbm_to_vmem [thread:$0]  (!%p729_p7), %s200_s30, 2048, %s202_s20, %s1181_s25, %s1058_s4, %s1058_s4, %s1059_s5  }
  0x36   : > { %s217_s8 = sand.u32 (!%p1218_p5), 1, %s1031_s16   ;;  %s216_s1 = scalar_lea.sflag (!%p1218_p5), [#allocation4], %s215_s0 }
  0x37   : > { %s648_s11 = sshll.u32 (!%p1218_p5), %s217_s8, 7 }
  0x38   : > { %s1260_s26 = scalar_lea.vmem (!%p1218_p5), [#allocation3], %s648_s11 }
  0x39   : > { %998 = dma.done.wait (%p1199_p0), %s216_s1, 2048  }
  0x3a   : > { %1000 = vsyncadd (%p1199_p0), %s216_s1, 4294965248 }
  0x3b   : > { %1002 = dma.done.wait (%p55_p10), [#allocation7], 4096  }
  0x3c   : > { %1004 = vsyncadd (%p55_p10), [#allocation7], 4294963200  ;;  %s232_s20 = sand.u32 1, %s1019_s13  }
  0x3d   : > { %s650_s21 = sshll.u32 %s232_s20, 7 }
  0x3e   : > { %s1273_s25 = scalar_lea.vmem [#allocation8], %s650_s21 }
  0x3f   : > { %1006 = dma.done.wait (%p1205_p1), %s216_s1, 2048  }
  0x40   : > { %1008 = vsyncadd (%p1205_p1), %s216_s1, 4294965248  ;;  %s1279_s4 = scalar_lea.vmem [#allocation9], %s650_s21  ;;  %p652_p2 = scmp.ne.s32.totalorder %s1039_s18, 0 }
  0x42   : > { %269 = sbr.rel (%p652_p2) target bundleno = 88 (0x58), region = 48 }
  0x47   : > { %v1061_v0 = vmov 0.0  }
  0x48   : > { %270 = vst [vmem:[#allocation2 + $0x30] sm:$0xff] %v1061_v0 }
  0x49   : > { %271 = vst [vmem:[#allocation2] sm:$0xff] %v1061_v0 }
  0x4a   : > { %272 = vst [vmem:[#allocation2 + $0x58] sm:$0xff] %v1061_v0 }
  0x4b   : > { %273 = vst [vmem:[#allocation2 + $0x18] sm:$0xff] %v1061_v0 }
  0x4c   : > { %274 = vst [vmem:[#allocation2 + $0x50] sm:$0xff] %v1061_v0 }
  0x4d   : > { %275 = vst [vmem:[#allocation2 + $0x68] sm:$0xff] %v1061_v0 }
  0x4e   : > { %276 = vst [vmem:[#allocation2 + $0x8] sm:$0xff] %v1061_v0 }
  0x4f   : > { %277 = vst [vmem:[#allocation2 + $0x48] sm:$0xff] %v1061_v0 }
  0x50   : > { %278 = vst [vmem:[#allocation2 + $0x40] sm:$0xff] %v1061_v0 }
  0x51   : > { %279 = vst [vmem:[#allocation2 + $0x20] sm:$0xff] %v1061_v0 }
  0x52   : > { %280 = vst [vmem:[#allocation2 + $0x10] sm:$0xff] %v1061_v0 }
  0x53   : > { %281 = vst [vmem:[#allocation2 + $0x38] sm:$0xff] %v1061_v0 }
  0x54   : > { %282 = vst [vmem:[#allocation2 + $0x60] sm:$0xff] %v1061_v0 }
  0x55   : > { %283 = vst [vmem:[#allocation2 + $0x70] sm:$0xff] %v1061_v0 }
  0x56   : > { %284 = vst [vmem:[#allocation2 + $0x78] sm:$0xff] %v1061_v0 }
  0x57   : > { %285 = vst [vmem:[#allocation2 + $0x28] sm:$0xff] %v1061_v0 }
  0x58 PF: > { %s653_s5 = sshll.u32 %s1039_s18, 7  ;;  %v311_v17 = vld [vmem:[%s1260_s26 + $0x40] sm:$0xff]  ;;  %v312_v21 = vld [vmem:[%s1260_s26 + $0x48] sm:$0xff]  ;;  %v313_v25 = vld [vmem:[%s1260_s26 + $0x50] sm:$0xff]  ;;  %p654_p6 = scmp.ne.s32.totalorder %s1039_s18, 1 }
  0x59   : > { %s1283_s23 = scalar_lea.vmem [#allocation6], %s653_s5  ;;  %v315_v18 = vld [vmem:[%s1260_s26 + $0x60] sm:$0xff]  ;;  %v316_v22 = vld [vmem:[%s1260_s26 + $0x68] sm:$0xff]  ;;  %v317_v26 = vld [vmem:[%s1260_s26 + $0x70] sm:$0xff] }
  0x5a   : > { %v335_v1 = vld [vmem:[%s1283_s23 + $0x78] sm:$0xff]  ;;  %v334_v2 = vld [vmem:[%s1283_s23 + $0x70] sm:$0xff]  ;;  %v333_v3 = vld [vmem:[%s1283_s23 + $0x68] sm:$0xff] }
  0x5b   : > { %664 = vmatpush.msra.mxu2 %v335_v1  ;;  %665 = vmatpush.msra.mxu3 %v335_v1  ;;  %v332_v4 = vld [vmem:[%s1283_s23 + $0x60] sm:$0xff]  ;;  %v331_v5 = vld [vmem:[%s1283_s23 + $0x58] sm:$0xff]  ;;  %v330_v6 = vld [vmem:[%s1283_s23 + $0x50] sm:$0xff] }
  0x5c   : > { %336 = vmatpush.msra.mxu0 %v335_v1  ;;  %663 = vmatpush.msra.mxu1 %v335_v1  ;;  %v329_v7 = vld [vmem:[%s1283_s23 + $0x48] sm:$0xff]  ;;  %v328_v8 = vld [vmem:[%s1283_s23 + $0x40] sm:$0xff]  ;;  %v327_v9 = vld [vmem:[%s1283_s23 + $0x38] sm:$0xff] }
  0x5d   : > { %667 = vmatpush.msra.mxu2 %v334_v2  ;;  %668 = vmatpush.msra.mxu3 %v334_v2  ;;  %v326_v10 = vld [vmem:[%s1283_s23 + $0x30] sm:$0xff]  ;;  %v325_v11 = vld [vmem:[%s1283_s23 + $0x28] sm:$0xff]  ;;  %v324_v12 = vld [vmem:[%s1283_s23 + $0x20] sm:$0xff] }
  0x5e   : > { %337 = vmatpush.msra.mxu0 %v334_v2  ;;  %666 = vmatpush.msra.mxu1 %v334_v2  ;;  %v323_v13 = vld [vmem:[%s1283_s23 + $0x18] sm:$0xff]  ;;  %v322_v14 = vld [vmem:[%s1283_s23 + $0x10] sm:$0xff]  ;;  %v321_v15 = vld [vmem:[%s1283_s23 + $0x8] sm:$0xff] }
  0x5f   : > { %670 = vmatpush.msra.mxu2 %v333_v3  ;;  %671 = vmatpush.msra.mxu3 %v333_v3  ;;  %v320_v16 = vld [vmem:[%s1283_s23] sm:$0xff]  ;;  %v304_v23 = vld [vmem:[%s1260_s26 + $0x8] sm:$0xff]  ;;  %v305_v27 = vld [vmem:[%s1260_s26 + $0x10] sm:$0xff] }
  0x60   : > { %338 = vmatpush.msra.mxu0 %v333_v3  ;;  %669 = vmatpush.msra.mxu1 %v333_v3  ;;  %v303_v19 = vld [vmem:[%s1260_s26] sm:$0xff]  ;;  %v308_v24 = vld [vmem:[%s1260_s26 + $0x28] sm:$0xff]  ;;  %v309_v28 = vld [vmem:[%s1260_s26 + $0x30] sm:$0xff] }
  0x61   : > { %673 = vmatpush.msra.mxu2 %v332_v4  ;;  %674 = vmatpush.msra.mxu3 %v332_v4  ;;  %v307_v20 = vld [vmem:[%s1260_s26 + $0x20] sm:$0xff]  ;;  %v314_v29 = vld [vmem:[%s1260_s26 + $0x58] sm:$0xff]  ;;  %v287_v33 = vld [vmem:[#allocation2 + $0x30] sm:$0xff] }
  0x62   : > { %339 = vmatpush.msra.mxu0 %v332_v4  ;;  %672 = vmatpush.msra.mxu1 %v332_v4  ;;  %v318_v30 = vld [vmem:[%s1260_s26 + $0x78] sm:$0xff]  ;;  %v291_v34 = vld [vmem:[#allocation2 + $0x50] sm:$0xff]  ;;  %v295_v39 = vld [vmem:[#allocation2 + $0x40] sm:$0xff] }
  0x63   : > { %676 = vmatpush.msra.mxu2 %v331_v5  ;;  %677 = vmatpush.msra.mxu3 %v331_v5  ;;  %v306_v31 = vld [vmem:[%s1260_s26 + $0x18] sm:$0xff]  ;;  %v299_v40 = vld [vmem:[#allocation2 + $0x60] sm:$0xff]  ;;  %v292_v46 = vld [vmem:[#allocation2 + $0x68] sm:$0xff] }
  0x64   : > { %340 = vmatpush.msra.mxu0 %v331_v5  ;;  %675 = vmatpush.msra.mxu1 %v331_v5  ;;  %v310_v32 = vld [vmem:[%s1260_s26 + $0x38] sm:$0xff]  ;;  %v288_v45 = vld [vmem:[#allocation2] sm:$0xff]  ;;  %v300_v52 = vld [vmem:[#allocation2 + $0x70] sm:$0xff] }
  0x65   : > { %679 = vmatpush.msra.mxu2 %v330_v6  ;;  %680 = vmatpush.msra.mxu3 %v330_v6  ;;  %v296_v51 = vld [vmem:[#allocation2 + $0x20] sm:$0xff]  ;;  %v289_v57 = vld [vmem:[#allocation2 + $0x58] sm:$0xff]  ;;  %v293_v58 = vld [vmem:[#allocation2 + $0x8] sm:$0xff] }
  0x66   : > { %341 = vmatpush.msra.mxu0 %v330_v6  ;;  %678 = vmatpush.msra.mxu1 %v330_v6  ;;  %v297_v63 = vld [vmem:[#allocation2 + $0x10] sm:$0xff]  ;;  %v301_v0 = vld [vmem:[#allocation2 + $0x78] sm:$0xff]  ;;  %v294_v6 = vld [vmem:[#allocation2 + $0x48] sm:$0xff] }
  0x67   : > { %682 = vmatpush.msra.mxu2 %v329_v7  ;;  %683 = vmatpush.msra.mxu3 %v329_v7  ;;  %v290_v5 = vld [vmem:[#allocation2 + $0x18] sm:$0xff] }
  0x68   : > { %342 = vmatpush.msra.mxu0 %v329_v7  ;;  %681 = vmatpush.msra.mxu1 %v329_v7 }
  0x69   : > { %685 = vmatpush.msra.mxu2 %v328_v8  ;;  %686 = vmatpush.msra.mxu3 %v328_v8 }
  0x6a   : > { %343 = vmatpush.msra.mxu0 %v328_v8  ;;  %684 = vmatpush.msra.mxu1 %v328_v8 }
  0x6b   : > { %688 = vmatpush.msra.mxu2 %v327_v9  ;;  %689 = vmatpush.msra.mxu3 %v327_v9 }
  0x6c   : > { %344 = vmatpush.msra.mxu0 %v327_v9  ;;  %687 = vmatpush.msra.mxu1 %v327_v9 }
  0x6d   : > { %691 = vmatpush.msra.mxu2 %v326_v10  ;;  %692 = vmatpush.msra.mxu3 %v326_v10 }
  0x6e   : > { %345 = vmatpush.msra.mxu0 %v326_v10  ;;  %690 = vmatpush.msra.mxu1 %v326_v10 }
  0x6f   : > { %694 = vmatpush.msra.mxu2 %v325_v11  ;;  %695 = vmatpush.msra.mxu3 %v325_v11 }
  0x70   : > { %346 = vmatpush.msra.mxu0 %v325_v11  ;;  %693 = vmatpush.msra.mxu1 %v325_v11  ;;  %v298_v11 = vld [vmem:[#allocation2 + $0x38] sm:$0xff] }
  0x71   : > { %697 = vmatpush.msra.mxu2 %v324_v12  ;;  %698 = vmatpush.msra.mxu3 %v324_v12 }
  0x72   : > { %347 = vmatpush.msra.mxu0 %v324_v12  ;;  %696 = vmatpush.msra.mxu1 %v324_v12  ;;  %v302_v12 = vld [vmem:[#allocation2 + $0x28] sm:$0xff] }
  0x73   : > { %700 = vmatpush.msra.mxu2 %v323_v13  ;;  %701 = vmatpush.msra.mxu3 %v323_v13 }
  0x74   : > { %348 = vmatpush.msra.mxu0 %v323_v13  ;;  %699 = vmatpush.msra.mxu1 %v323_v13 }
  0x75   : > { %703 = vmatpush.msra.mxu2 %v322_v14  ;;  %704 = vmatpush.msra.mxu3 %v322_v14 }
  0x76   : > { %349 = vmatpush.msra.mxu0 %v322_v14  ;;  %702 = vmatpush.msra.mxu1 %v322_v14 }
  0x77   : > { %706 = vmatpush.msra.mxu2 %v321_v15  ;;  %707 = vmatpush.msra.mxu3 %v321_v15 }
  0x78   : > { %350 = vmatpush.msra.mxu0 %v321_v15  ;;  %705 = vmatpush.msra.mxu1 %v321_v15 }
  0x79   : > { %709 = vmatpush.msra.mxu2 %v320_v16  ;;  %710 = vmatpush.msra.mxu3 %v320_v16 }
  0x7a   : > { %376 = vmatmul.f32.vlgmr.msra.gmra.mxu2 %v311_v17  ;;  %388 = vmatmul.f32.vlgmr.msra.gmra.mxu3 %v315_v18 }
  0x7b   : > { %351 = vmatpush.msra.mxu0 %v320_v16  ;;  %708 = vmatpush.msra.mxu1 %v320_v16 }
  0x7c   : > { %352 = vmatmul.f32.vlgmr.msra.gmra.mxu0 %v303_v19  ;;  %364 = vmatmul.f32.vlgmr.msra.gmra.mxu1 %v307_v20 }
  0x82   : > { %379 = vmatmul.f32.gmra.mxu2 %v312_v21  ;;  %391 = vmatmul.f32.gmra.mxu3 %v316_v22 }
  0x84   : > { %355 = vmatmul.f32.gmra.mxu0 %v304_v23  ;;  %367 = vmatmul.f32.gmra.mxu1 %v308_v24 }
  0x8a   : > { %382 = vmatmul.f32.gmra.mxu2 %v313_v25  ;;  %394 = vmatmul.f32.gmra.mxu3 %v317_v26 }
  0x8c   : > { %358 = vmatmul.f32.gmra.mxu0 %v305_v27  ;;  %370 = vmatmul.f32.gmra.mxu1 %v309_v28 }
  0x92   : > { %385 = vmatmul.f32.gmra.mxu2 %v314_v29  ;;  %397 = vmatmul.f32.gmra.mxu3 %v318_v30 }
  0x94   : > { %361 = vmatmul.f32.gmra.mxu0 %v306_v31  ;;  %373 = vmatmul.f32.gmra.mxu1 %v310_v32 }
  0xf9   : > { %v353_v35 = vpop.f32.mrf.mxu0  ;;  %v365_v36 = vpop.f32.mrf.mxu1 }
  0xfa   : > { %v401_v37 = vadd.f32 %v353_v35, %v287_v33  ;;  %v405_v38 = vadd.f32 %v365_v36, %v291_v34 }
  0xfc   : > { %417 = vst [vmem:[#allocation2 + $0x30] sm:$0xff] %v401_v37 }
  0xfd   : > { %421 = vst [vmem:[#allocation2 + $0x50] sm:$0xff] %v405_v38  ;;  %v377_v41 = vpop.f32.mrf.mxu2  ;;  %v389_v42 = vpop.f32.mrf.mxu3 }
  0xfe   : > { %v409_v43 = vadd.f32 %v377_v41, %v295_v39  ;;  %v413_v44 = vadd.f32 %v389_v42, %v299_v40 }
 0x100   : > { %425 = vst [vmem:[#allocation2 + $0x40] sm:$0xff] %v409_v43 }
 0x101   : > { %429 = vst [vmem:[#allocation2 + $0x60] sm:$0xff] %v413_v44  ;;  %v356_v47 = vpop.f32.mrf.mxu0  ;;  %v368_v48 = vpop.f32.mrf.mxu1 }
 0x102   : > { %v402_v49 = vadd.f32 %v356_v47, %v288_v45  ;;  %v406_v50 = vadd.f32 %v368_v48, %v292_v46 }
 0x104   : > { %418 = vst [vmem:[#allocation2] sm:$0xff] %v402_v49 }
 0x105   : > { %422 = vst [vmem:[#allocation2 + $0x68] sm:$0xff] %v406_v50  ;;  %v380_v53 = vpop.f32.mrf.mxu2  ;;  %v392_v54 = vpop.f32.mrf.mxu3 }
 0x106   : > { %v410_v55 = vadd.f32 %v380_v53, %v296_v51  ;;  %v414_v56 = vadd.f32 %v392_v54, %v300_v52 }
 0x108   : > { %426 = vst [vmem:[#allocation2 + $0x20] sm:$0xff] %v410_v55 }
 0x109   : > { %430 = vst [vmem:[#allocation2 + $0x70] sm:$0xff] %v414_v56  ;;  %v359_v59 = vpop.f32.mrf.mxu0  ;;  %v371_v60 = vpop.f32.mrf.mxu1 }
 0x10a   : > { %v403_v61 = vadd.f32 %v359_v59, %v289_v57  ;;  %v407_v62 = vadd.f32 %v371_v60, %v293_v58 }
 0x10c   : > { %419 = vst [vmem:[#allocation2 + $0x58] sm:$0xff] %v403_v61 }
 0x10d   : > { %423 = vst [vmem:[#allocation2 + $0x8] sm:$0xff] %v407_v62  ;;  %v383_v1 = vpop.f32.mrf.mxu2  ;;  %v395_v2 = vpop.f32.mrf.mxu3 }
 0x10e   : > { %v411_v3 = vadd.f32 %v383_v1, %v297_v63  ;;  %v415_v4 = vadd.f32 %v395_v2, %v301_v0 }
 0x110   : > { %427 = vst [vmem:[#allocation2 + $0x10] sm:$0xff] %v411_v3 }
 0x111   : > { %431 = vst [vmem:[#allocation2 + $0x78] sm:$0xff] %v415_v4  ;;  %v362_v7 = vpop.f32.mrf.mxu0  ;;  %v374_v8 = vpop.f32.mrf.mxu1 }
 0x112   : > { %v404_v9 = vadd.f32 %v362_v7, %v290_v5  ;;  %v408_v10 = vadd.f32 %v374_v8, %v294_v6 }
 0x114   : > { %420 = vst [vmem:[#allocation2 + $0x18] sm:$0xff] %v404_v9 }
 0x115   : > { %424 = vst [vmem:[#allocation2 + $0x48] sm:$0xff] %v408_v10  ;;  %v386_v13 = vpop.f32.mrf.mxu2  ;;  %v398_v14 = vpop.f32.mrf.mxu3  ;;  %436 = sbr.rel (%p654_p6) target bundleno = 301 (0x12d), region = 52 }
 0x116   : > { %v412_v15 = vadd.f32 %v386_v13, %v298_v11  ;;  %v416_v16 = vadd.f32 %v398_v14, %v302_v12 }
 0x118   : > { %428 = vst [vmem:[#allocation2 + $0x38] sm:$0xff] %v412_v15 }
 0x119   : > { %432 = vst [vmem:[#allocation2 + $0x28] sm:$0xff] %v416_v16 }
 0x11a   : > { %v437_v17 = vld [vmem:[#allocation2 + $0x30] sm:$0xff]  ;;  %v453_v18 = vld [vmem:[%s1273_s25] sm:$0xff]  ;;  %v454_v21 = vld [vmem:[%s1273_s25 + $0x8] sm:$0xff] }
 0x11b   : > { %v438_v19 = vld [vmem:[#allocation2] sm:$0xff]  ;;  %v469_v20 = vadd.f32 %v453_v18, %v437_v17  ;;  %v439_v22 = vld [vmem:[#allocation2 + $0x58] sm:$0xff]  ;;  %v455_v23 = vld [vmem:[%s1273_s25 + $0x10] sm:$0xff] }
 0x11c   : > { %v470_v24 = vadd.f32 %v454_v21, %v438_v19  ;;  %v471_v25 = vadd.f32 %v455_v23, %v439_v22  ;;  %v440_v26 = vld [vmem:[#allocation2 + $0x18] sm:$0xff]  ;;  %v441_v28 = vld [vmem:[#allocation2 + $0x50] sm:$0xff]  ;;  %v457_v30 = vld [vmem:[%s1273_s25 + $0x20] sm:$0xff] }
 0x11d   : > { %v456_v27 = vld [vmem:[%s1273_s25 + $0x18] sm:$0xff]  ;;  %485 = vst [vmem:[%s1279_s4] sm:$0xff] %v469_v20  ;;  %v442_v31 = vld [vmem:[#allocation2 + $0x68] sm:$0xff]  ;;  %v473_v33 = vadd.f32 %v457_v30, %v441_v28  ;;  %v459_v36 = vld [vmem:[%s1273_s25 + $0x30] sm:$0xff] }
 0x11e   : > { %v472_v29 = vadd.f32 %v456_v27, %v440_v26  ;;  %v458_v32 = vld [vmem:[%s1273_s25 + $0x28] sm:$0xff]  ;;  %486 = vst [vmem:[%s1279_s4 + $0x8] sm:$0xff] %v470_v24  ;;  %v460_v39 = vld [vmem:[%s1273_s25 + $0x38] sm:$0xff]  ;;  %v445_v40 = vld [vmem:[#allocation2 + $0x40] sm:$0xff] }
 0x11f   : > { %v474_v34 = vadd.f32 %v458_v32, %v442_v31  ;;  %v443_v35 = vld [vmem:[#allocation2 + $0x8] sm:$0xff]  ;;  %487 = vst [vmem:[%s1279_s4 + $0x10] sm:$0xff] %v471_v25  ;;  %v461_v41 = vld [vmem:[%s1273_s25 + $0x40] sm:$0xff]  ;;  %v447_v45 = vld [vmem:[#allocation2 + $0x10] sm:$0xff] }
 0x120   : > { %v444_v37 = vld [vmem:[#allocation2 + $0x48] sm:$0xff]  ;;  %v475_v38 = vadd.f32 %v459_v36, %v443_v35  ;;  %488 = vst [vmem:[%s1279_s4 + $0x18] sm:$0xff] %v472_v29  ;;  %v446_v43 = vld [vmem:[#allocation2 + $0x20] sm:$0xff]  ;;  %v477_v46 = vadd.f32 %v461_v41, %v445_v40  ;;  %v463_v47 = vld [vmem:[%s1273_s25 + $0x50] sm:$0xff] }
 0x121   : > { %v476_v42 = vadd.f32 %v460_v39, %v444_v37  ;;  %v462_v44 = vld [vmem:[%s1273_s25 + $0x48] sm:$0xff]  ;;  %489 = vst [vmem:[%s1279_s4 + $0x20] sm:$0xff] %v473_v33  ;;  %v448_v48 = vld [vmem:[#allocation2 + $0x38] sm:$0xff]  ;;  %v449_v51 = vld [vmem:[#allocation2 + $0x60] sm:$0xff]  ;;  %v479_v53 = vadd.f32 %v463_v47, %v447_v45 }
 0x122   : > { %v464_v49 = vld [vmem:[%s1273_s25 + $0x58] sm:$0xff]  ;;  %490 = vst [vmem:[%s1279_s4 + $0x28] sm:$0xff] %v474_v34  ;;  %v478_v50 = vadd.f32 %v462_v44, %v446_v43  ;;  %v465_v52 = vld [vmem:[%s1273_s25 + $0x60] sm:$0xff]  ;;  %v450_v54 = vld [vmem:[#allocation2 + $0x70] sm:$0xff] }
 0x123   : > { %491 = vst [vmem:[%s1279_s4 + $0x30] sm:$0xff] %v475_v38  ;;  %v466_v55 = vld [vmem:[%s1273_s25 + $0x68] sm:$0xff]  ;;  %v480_v56 = vadd.f32 %v464_v49, %v448_v48  ;;  %v451_v57 = vld [vmem:[#allocation2 + $0x78] sm:$0xff]  ;;  %v467_v58 = vld [vmem:[%s1273_s25 + $0x70] sm:$0xff]  ;;  %v481_v59 = vadd.f32 %v465_v52, %v449_v51 }
 0x124   : > { %492 = vst [vmem:[%s1279_s4 + $0x38] sm:$0xff] %v476_v42  ;;  %v452_v60 = vld [vmem:[#allocation2 + $0x28] sm:$0xff]  ;;  %v468_v61 = vld [vmem:[%s1273_s25 + $0x78] sm:$0xff]  ;;  %v482_v62 = vadd.f32 %v466_v55, %v450_v54  ;;  %v483_v63 = vadd.f32 %v467_v58, %v451_v57 }
 0x125   : > { %493 = vst [vmem:[%s1279_s4 + $0x40] sm:$0xff] %v477_v46  ;;  %v484_v0 = vadd.f32 %v468_v61, %v452_v60 }
 0x126   : > { %494 = vst [vmem:[%s1279_s4 + $0x48] sm:$0xff] %v478_v50 }
 0x127   : > { %495 = vst [vmem:[%s1279_s4 + $0x50] sm:$0xff] %v479_v53 }
 0x128   : > { %496 = vst [vmem:[%s1279_s4 + $0x58] sm:$0xff] %v480_v56 }
 0x129   : > { %497 = vst [vmem:[%s1279_s4 + $0x60] sm:$0xff] %v481_v59 }
 0x12a   : > { %498 = vst [vmem:[%s1279_s4 + $0x68] sm:$0xff] %v482_v62 }
 0x12b   : > { %499 = vst [vmem:[%s1279_s4 + $0x70] sm:$0xff] %v483_v63 }
 0x12c   : > { %500 = vst [vmem:[%s1279_s4 + $0x78] sm:$0xff] %v484_v0 }
 0x12d PF: > { %s662_s18 = sshll.u32 %s1043_s19, 7  ;;  %s1428_s9 = sld [smem:[#allocation20_spill]] }
 0x12e   : > { %s514_s10 = sshll.u32 %s1279_s4, 4  ;;  %s502_s30 = scalar_lea.sflag [#allocation5], %s232_s20  ;;  %s515_s10 = int_to_ptr.vmem [resolvable:$true] %s514_s10 }
 0x133   : > { %s513_s7 = scalar_lea.hbm %s1428_s9, %s662_s18  ;;  %s945_s19 = scalar_lea.hbm %s1428_s9, 256 }
 0x134   : > { %s516_s28 = sshll.u32 %s513_s7, 4  ;;  %s517_s28 = int_to_ptr.hbm [resolvable:$true] %s516_s28 }
 0x135   : > { %s939_s0 = sshra.s32 %s517_s28, 4  ;;  %s940_s0 = int_to_ptr.hbm [resolvable:$true] %s939_s0 }
 0x136   : > { %s941_s8 = scalar_lea.hbm %s940_s0, 128  ;;  %p946_p1 = scmp.lt.s32.totalorder %s940_s0, %s1428_s9 }
 0x137   : > { %p942_p10 = scmp.ne.s32.totalorder %s940_s0, %s941_s8  ;;  %p947_p5 = scmp.lt.s32.totalorder %s945_s19, %s941_s8 }
 0x139   : > { %p943_p12 = pnand %p942_p10, %p1242_p8  ;;  %p948_p9 = por %p947_p5, %p946_p1 }
 0x13b   : > { %p944_p0 = pneg %p943_p12 }
 0x13d   : > { %p949_p11 = pnand %p948_p9, %p944_p0 }
 0x13f   : > { %952 = shalt.err (!%p949_p11)
}
 0x140   : > { %s1062_s20 = smov 128   ;;  %s1063_s25 = smov 8  }
 0x141   : > { %719 = dma.vmem_to_hbm [thread:$0]  (%p1242_p8), %s515_s10, 2048, %s517_s28, %s502_s30, %s1062_s20, %s1062_s20, %s1063_s25  }
 0x142 PF: > { %p739_p13 = scmp.ge.s32.totalorder %s1055_s22, 2  ;;  %s531_s4 = sand.u32 1, %s1015_s12  }
 0x143   : > { %s532_s5 = scalar_lea.sflag [#allocation5], %s531_s4 }
 0x144   : > { %p733_p4 = pnand %p739_p13, %p1209_p3 }
 0x146   : > { %p734_p7 = pneg %p733_p4 }
 0x148   : > { %1010 = dma.done.wait (%p734_p7), %s532_s5, 2048  }
 0x149   : > { %1012 = vsyncadd (%p734_p7), %s532_s5, 4294965248  ;;  %s20_s22 = sadd.s32 1, %s1055_s22   ;;  %s1429_s18 = sld [smem:[#allocation14_spill]] }
 0x14a   : > { %p17_p2 = scmp.ge.s32.totalorder %s20_s22, 6   ;;  %s1430_s19 = sld [smem:[#allocation15_spill]] }
 0x14b   : > { %s1431_s20 = sld [smem:[#allocation16_spill]]  ;;  %s1433_s12 = smov %s1019_s13 }
 0x14c   : > { %s1432_s21 = sld [smem:[#allocation17_spill]]  ;;  %s1434_s13 = smov %s1023_s14 }
 0x14d   : > { %s1435_s14 = smov %s1231_s24  ;;  %s1436_s15 = smov %s1031_s16 }
 0x14e   : > { %s1437_s16 = smov %s1035_s17  ;;  %s1438_s17 = smov %s1171_s6 }
 0x14f   :  { %19 = sbr.rel (!%p17_p2) target bundleno = 14 (0xe), region = 101 }
 0x154   :  { %538 = vsyncpa [#allocation4], 1 }
 0x155   :  { %540 = vsyncpa [#allocation4 + $0x1], 1 }
 0x156   :  { %541 = vsyncpa [#allocation7], 1 }
 0x157   :  { %542 = vsyncpa [#allocation5], 1 }
 0x158   :  { %544 = vsyncpa [#allocation5 + $0x1], 1 }

</bundles_post_ra>
